<compile_context>
chip_gen: v7x
topology: tpu7x:2x2x1
jax: 0.10.0
libtpu: 0.0.40
codegen_flags: <defaults>
</compile_context>

<pallas_src>
import functools

import jax
import jax.numpy as jnp
from jax import lax
from jax.experimental import pallas as pl
from jax.experimental.pallas import tpu as pltpu

_VMEM_LIMIT = 32 * 1024 * 1024      # default scoped VMEM; fits v7x's 64 MiB


def _round_up(x, m):
    return ((x + m - 1) // m) * m


# ----------------------------------------------------------------------------
# Tiled matmul + bias kernels:  (M, K) @ (K, N) + b  (bf16 operands, f32 acc).
# Used for (a) the hoisted LSTM input projection and (b) the decoder Linear.
# ----------------------------------------------------------------------------
def _matmul_bias_kernel(x_ref, w_ref, b_ref, o_ref):
    # Single-K-step grid: write directly, no accumulator scratch round-trip.
    o_ref[...] = (jnp.dot(x_ref[...], w_ref[...],
                          preferred_element_type=jnp.float32)
                  + b_ref[...]).astype(o_ref.dtype)


def _matmul_bias_acc_kernel(x_ref, w_ref, b_ref, o_ref, acc_ref):
    @pl.when(pl.program_id(2) == 0)
    def _():
        acc_ref[...] = jnp.zeros_like(acc_ref)

    acc_ref[...] += jnp.dot(x_ref[...], w_ref[...],
                            preferred_element_type=jnp.float32)

    @pl.when(pl.program_id(2) == pl.num_programs(2) - 1)
    def _():
        # Bias fused only on the final k step.
        o_ref[...] = (acc_ref[...] + b_ref[...]).astype(o_ref.dtype)


def matmul_bias(x, w, b, *, out_dtype=jnp.float32, tm=512, tn=1024, tk=None):
    """x: (M, K); w: (K, N); b: (1, N) -> (M, N) in out_dtype.

    Operands are cast to bf16 for MXU throughput; accumulation is f32.
    M/N/K are padded to tile multiples and the result sliced back.
    """
    M, K = x.shape
    _, N = w.shape
    x = x.astype(jnp.bfloat16)
    w = w.astype(jnp.bfloat16)
    b = b.astype(jnp.float32)

    if tk is None:
        tk = K                              # full-K resident accumulation
    tm = min(tm, _round_up(M, 8))
    tn = min(tn, _round_up(N, 128))
    tk = min(tk, K)
    Mp, Np, Kp = _round_up(M, tm), _round_up(N, tn), _round_up(K, tk)

    x_p = jnp.pad(x, ((0, Mp - M), (0, Kp - K)))
    w_p = jnp.pad(w, ((0, Kp - K), (0, Np - N)))
    b_p = jnp.pad(b, ((0, 0), (0, Np - N)))

    nk = Kp // tk
    if nk == 1:
        out = pl.pallas_call(
            _matmul_bias_kernel,
            out_shape=jax.ShapeDtypeStruct((Mp, Np), out_dtype),
            grid_spec=pltpu.PrefetchScalarGridSpec(
                num_scalar_prefetch=0,
                grid=(Mp // tm, Np // tn),
                in_specs=[
                    pl.BlockSpec((tm, tk), lambda i, j: (i, 0)),
                    pl.BlockSpec((tk, tn), lambda i, j: (0, j)),
                    pl.BlockSpec((1, tn), lambda i, j: (0, j)),
                ],
                out_specs=pl.BlockSpec((tm, tn), lambda i, j: (i, j)),
            ),
            compiler_params=pltpu.CompilerParams(
                dimension_semantics=("parallel", "parallel"),
                vmem_limit_bytes=_VMEM_LIMIT),
        )(x_p, w_p, b_p)
    else:
        out = pl.pallas_call(
            _matmul_bias_acc_kernel,
            out_shape=jax.ShapeDtypeStruct((Mp, Np), out_dtype),
            grid_spec=pltpu.PrefetchScalarGridSpec(
                num_scalar_prefetch=0,
                grid=(Mp // tm, Np // tn, nk),
                in_specs=[
                    pl.BlockSpec((tm, tk), lambda i, j, k: (i, k)),
                    pl.BlockSpec((tk, tn), lambda i, j, k: (k, j)),
                    pl.BlockSpec((1, tn), lambda i, j, k: (0, j)),
                ],
                out_specs=pl.BlockSpec((tm, tn), lambda i, j, k: (i, j)),
                scratch_shapes=[pltpu.VMEM((tm, tn), jnp.float32)],
            ),
            compiler_params=pltpu.CompilerParams(
                dimension_semantics=("parallel", "parallel", "arbitrary"),
                vmem_limit_bytes=_VMEM_LIMIT),
        )(x_p, w_p, b_p)
    return out[:M, :N]


# ----------------------------------------------------------------------------
# LSTM recurrence kernel: grid = (batch blocks [parallel], time chunks
# [arbitrary]); hidden/cell state lives in VMEM scratch per batch block and
# persists across time chunks.  Per timestep:
#   gates = gates_x[t] + h @ W_hh   (input projection precomputed outside).
# Padded tail timesteps (S -> S_pad) carry h/c through unchanged.
# ----------------------------------------------------------------------------
def _lstm_chunk_kernel(gx_ref, whh_ref, h0_ref, c0_ref,
                       out_ref, hfin_ref, cfin_ref, h_sc, c_sc,
                       *, seq_len, seq_pad):
    t = pl.program_id(1)

    @pl.when(t == 0)
    def _():
        h_sc[...] = h0_ref[...]
        c_sc[...] = c0_ref[...]

    chunk = gx_ref.shape[0]
    Hp = h_sc.shape[-1]
    whh = whh_ref[...]                                     # (Hp, 4Hp) bf16
    base = t * chunk

    def step(i, carry):
        h, c = carry                                       # (Bb, Hp) f32
        gates = gx_ref[i].astype(jnp.float32) + jnp.dot(
            h.astype(jnp.bfloat16), whh, preferred_element_type=jnp.float32)
        # Gate layout is [i, f, o, g]; Hp is a multiple of 128 so slices are
        # lane-aligned and the three sigmoids act on one contiguous slab.
        sig = jax.nn.sigmoid(gates[:, 0:3 * Hp])
        i_g = sig[:, 0 * Hp:1 * Hp]
        f_g = sig[:, 1 * Hp:2 * Hp]
        o_g = sig[:, 2 * Hp:3 * Hp]
        g_g = jnp.tanh(gates[:, 3 * Hp:4 * Hp])
        c_new = f_g * c + i_g * g_g
        h_new = o_g * jnp.tanh(c_new)
        if seq_pad != seq_len:
            # Masked tail: padded timesteps carry state through unchanged.
            valid = (base + i) < seq_len
            h_new = jnp.where(valid, h_new, h)
            c_new = jnp.where(valid, c_new, c)
        out_ref[i] = h_new.astype(out_ref.dtype)           # bf16 stream
        return h_new, c_new

    h_fin, c_fin = lax.fori_loop(0, chunk, step, (h_sc[...], c_sc[...]),
                                 unroll=True)
    h_sc[...] = h_fin
    c_sc[...] = c_fin

    @pl.when(t == pl.num_programs(1) - 1)
    def _():
        hfin_ref[...] = h_fin                              # f32 final state
        cfin_ref[...] = c_fin


def lstm_recurrence(gates_x, w_hh_t, h0, c0, *, chunk=8):
    """gates_x: (S, Bp, 4Hp) bf16; w_hh_t: (Hp, 4Hp) bf16; h0,c0: (Bp,Hp) f32.
    Returns out (S, Bp, Hp) bf16, h_final (Bp, Hp) f32, c_final (Bp, Hp) f32."""
    S, Bp, G = gates_x.shape
    Hp = G // 4

    chunk = min(chunk, S)
    S_pad = _round_up(S, chunk)
    if S_pad != S:
        gates_x = jnp.pad(gates_x, ((0, S_pad - S), (0, 0), (0, 0)))
    n_chunks = S_pad // chunk

    # Batch-block split: lets v7x shard the recurrence across its 2 TCs when
    # the (padded) batch is large enough; single block otherwise.
    if Bp >= 16 and Bp % 16 == 0:
        Bb = Bp // 2
    else:
        Bb = Bp
    nb = Bp // Bb

    kernel = functools.partial(_lstm_chunk_kernel, seq_len=S, seq_pad=S_pad)

    out, h_fin, c_fin = pl.pallas_call(
        kernel,
        out_shape=(jax.ShapeDtypeStruct((S_pad, Bp, Hp), jnp.bfloat16),
                   jax.ShapeDtypeStruct((Bp, Hp), jnp.float32),
                   jax.ShapeDtypeStruct((Bp, Hp), jnp.float32)),
        grid_spec=pltpu.PrefetchScalarGridSpec(
            num_scalar_prefetch=0,
            grid=(nb, n_chunks),
            in_specs=[
                pl.BlockSpec((chunk, Bb, G), lambda b, t: (t, b, 0)),
                pl.BlockSpec((Hp, G), lambda b, t: (0, 0)),   # constant block
                pl.BlockSpec((Bb, Hp), lambda b, t: (b, 0)),
                pl.BlockSpec((Bb, Hp), lambda b, t: (b, 0)),
            ],
            out_specs=[
                pl.BlockSpec((chunk, Bb, Hp), lambda b, t: (t, b, 0)),
                pl.BlockSpec((Bb, Hp), lambda b, t: (b, 0)),
                pl.BlockSpec((Bb, Hp), lambda b, t: (b, 0)),
            ],
            scratch_shapes=[pltpu.VMEM((Bb, Hp), jnp.float32),
                            pltpu.VMEM((Bb, Hp), jnp.float32)],
        ),
        compiler_params=pltpu.CompilerParams(
            dimension_semantics=("parallel", "arbitrary"),
            vmem_limit_bytes=_VMEM_LIMIT),
    )(gates_x, w_hh_t, h0, c0)
    return out[:S], h_fin, c_fin


# ----------------------------------------------------------------------------
# Full RNNModel forward (LSTM variant, nlayers=1)
# ----------------------------------------------------------------------------
def rnn_model_forward(tokens, hidden, params):
    """tokens: (S, B) int32; hidden: (h0, c0), each (1, B, H) f32."""
    S, B = tokens.shape
    H, V, E = params["H"], params["V"], params["E"]
    Hp, Vp = params["Hp"], params["Vp"]
    Bp = _round_up(max(B, 8), 8)
    h0, c0 = hidden

    # Embedding lookup (gather) -- glue in plain JAX; bf16 table so the
    # projection's bf16 cast is a no-op.
    emb = jnp.take(params["embedding"], tokens, axis=0)          # (S, B, E)
    # drop(emb): identity (eval mode)

    # Pad batch to a sublane multiple; padded rows are sliced away at the end.
    emb_p = jnp.pad(emb, ((0, 0), (0, Bp - B), (0, 0)))

    # (1) Hoisted input projection for all timesteps (bf16 gates stream).
    gates_x = matmul_bias(emb_p.reshape(S * Bp, E),
                          params["w_ih_t"], params["b_lstm"],
                          out_dtype=jnp.bfloat16)                # (S*Bp, 4Hp)
    gates_x = gates_x.reshape(S, Bp, 4 * Hp)

    # (2) Sequential recurrence, chunked over time, batch-block parallel.
    h0_p = jnp.pad(h0[0], ((0, Bp - B), (0, Hp - H)))
    c0_p = jnp.pad(c0[0], ((0, Bp - B), (0, Hp - H)))
    out_p, h_fin, c_fin = lstm_recurrence(gates_x, params["w_hh_t"],
                                          h0_p, c0_p)

    hN = h_fin[:B, :H][None]                                     # (1, B, H) f32
    cN = c_fin[:B, :H][None]                                     # (1, B, H) f32
    # drop(output): identity (eval mode)

    # (3) Decoder nn.Linear, tiled over (M, V).  f32 logits to match the
    #     PyTorch module's output dtype; use out_dtype=bf16 if the downstream
    #     loss tolerates it (halves the largest HBM write at real vocab size).
    dec_p = matmul_bias(out_p.reshape(S * Bp, Hp),
                        params["fc_w_t"], params["fc_b"],
                        out_dtype=jnp.float32)                   # (S*Bp, Vp)
    decode = dec_p.reshape(S, Bp, Vp)[:, :B, :V]
    return decode, (hN, cN)


def init_params(key, vocab_size, emb_size, hid_size):
    """Matches RNNModel.init_weights + PyTorch LSTM default init.

    Returns (params, raw): `params` holds padded / transposed / bf16 kernel
    layouts (gate order [i, f, o, g], per-gate lane padding); `raw` holds the
    original PyTorch-layout f32 tensors for the pure-JAX reference check."""
    initrange = 0.1
    stdv = 1.0 / (hid_size ** 0.5)
    k = jax.random.split(key, 6)

    embedding = jax.random.uniform(k[0], (vocab_size, emb_size),
                                   minval=-initrange, maxval=initrange,
                                   dtype=jnp.float32)
    fc_w = jax.random.uniform(k[1], (vocab_size, hid_size),
                              minval=-initrange, maxval=initrange,
                              dtype=jnp.float32)
    fc_b = jnp.zeros((vocab_size,), jnp.float32)
    w_ih = jax.random.uniform(k[2], (4 * hid_size, emb_size),
                              minval=-stdv, maxval=stdv, dtype=jnp.float32)
    w_hh = jax.random.uniform(k[3], (4 * hid_size, hid_size),
                              minval=-stdv, maxval=stdv, dtype=jnp.float32)
    b_ih = jax.random.uniform(k[4], (4 * hid_size,),
                              minval=-stdv, maxval=stdv, dtype=jnp.float32)
    b_hh = jax.random.uniform(k[5], (4 * hid_size,),
                              minval=-stdv, maxval=stdv, dtype=jnp.float32)

    H, E, V = hid_size, emb_size, vocab_size
    Hp = _round_up(H, 128)
    Vp = _round_up(V, 128)

    # Kernel gate order [i, f, o, g] (PyTorch packs [i, f, g, o]); 4H gate
    # axis padded PER GATE (H -> Hp) so i/f/o/g slices stay lane-aligned.
    order = jnp.array([0, 1, 3, 2])

    wih = jnp.pad(w_ih.reshape(4, H, E)[order], ((0, 0), (0, Hp - H), (0, 0)))
    w_ih_t = jnp.transpose(wih, (2, 0, 1)).reshape(E, 4 * Hp)    # (E, 4Hp)

    whh = jnp.pad(w_hh.reshape(4, H, H)[order],
                  ((0, 0), (0, Hp - H), (0, Hp - H)))
    w_hh_t = jnp.transpose(whh, (2, 0, 1)).reshape(Hp, 4 * Hp)   # (Hp, 4Hp)

    b_lstm = jnp.pad((b_ih + b_hh).reshape(4, H)[order],
                     ((0, 0), (0, Hp - H))).reshape(1, 4 * Hp)

    fc_w_t = jnp.pad(fc_w, ((0, Vp - V), (0, Hp - H))).T         # (Hp, Vp)
    fc_b_p = jnp.pad(fc_b, (0, Vp - V)).reshape(1, Vp)

    params = {
        "embedding": embedding.astype(jnp.bfloat16),
        "w_ih_t": w_ih_t.astype(jnp.bfloat16),
        "w_hh_t": w_hh_t.astype(jnp.bfloat16),
        "b_lstm": b_lstm.astype(jnp.float32),
        "fc_w_t": fc_w_t.astype(jnp.bfloat16),
        "fc_b": fc_b_p.astype(jnp.float32),
        "H": H, "E": E, "V": V, "Hp": Hp, "Vp": Vp,
    }
    raw = {"embedding": embedding, "w_ih": w_ih, "w_hh": w_hh,
           "b_ih": b_ih, "b_hh": b_hh, "fc_w": fc_w, "fc_b": fc_b}
    return params, raw


def reference_forward(tokens, hidden, raw):
    """Pure-JAX f32 reference of the PyTorch forward (eval mode)."""
    emb = raw["embedding"][tokens]                               # (S, B, E)
    h, c = hidden[0][0], hidden[1][0]
    W_ih, W_hh = raw["w_ih"], raw["w_hh"]
    bias = raw["b_ih"] + raw["b_hh"]
    H = h.shape[-1]
    outs = []
    for t in range(emb.shape[0]):
        g = emb[t] @ W_ih.T + h @ W_hh.T + bias
        i = jax.nn.sigmoid(g[:, :H])
        f = jax.nn.sigmoid(g[:, H:2 * H])
        gg = jnp.tanh(g[:, 2 * H:3 * H])
        o = jax.nn.sigmoid(g[:, 3 * H:])
        c = f * c + i * gg
        h = o * jnp.tanh(c)
        outs.append(h)
    out = jnp.stack(outs)                                        # (S, B, H)
    dec = out @ raw["fc_w"].T + raw["fc_b"]
    return dec, (h[None], c[None])


if __name__ == "__main__":
    vocab_size, emb_size, hid_size = 32, 16, 32
    seq_len, batch = 8, 4

    key = jax.random.PRNGKey(0)
    pkey, tkey = jax.random.split(key)
    params, raw = init_params(pkey, vocab_size, emb_size, hid_size)

    tokens = jax.random.randint(tkey, (seq_len, batch), 0, vocab_size,
                                dtype=jnp.int32)
    # init_hidden for LSTM: zeros (nlayers, batch, hid) for h and c.
    h0 = jnp.zeros((1, batch, hid_size), jnp.float32)
    c0 = jnp.zeros((1, batch, hid_size), jnp.float32)

    decode, (hN, cN) = rnn_model_forward(tokens, (h0, c0), params)
    jax.block_until_ready((decode, hN, cN))

    assert decode.shape == (seq_len, batch, vocab_size)
    assert hN.shape == (1, batch, hid_size)
    assert cN.shape == (1, batch, hid_size)

    # Correctness vs pure-JAX f32 reference (kernel uses bf16 matmul operands,
    # bf16 gates_x / hidden stream, f32 accumulation -> loose tolerance).
    ref_dec, (ref_h, ref_c) = reference_forward(tokens, (h0, c0), raw)
    assert jnp.allclose(decode, ref_dec, atol=2e-2, rtol=2e-2)
    assert jnp.allclose(hN, ref_h, atol=2e-2, rtol=2e-2)
    assert jnp.allclose(cN, ref_c, atol=2e-2, rtol=2e-2)

    print("KERNEL_OK")
</pallas_src>

<mosaic_0001>
module attributes {stable_mosaic.version = 11 : i64} {
  func.func @_matmul_bias_kernel(%arg0: i32, %arg1: i32, %arg2: memref<64x16xbf16, #tpu.memory_space<vmem>>, %arg3: memref<16x512xbf16, #tpu.memory_space<vmem>>, %arg4: memref<1x512xf32, #tpu.memory_space<vmem>>, %arg5: memref<64x512xbf16, #tpu.memory_space<vmem>>) attributes {dimension_semantics = [#tpu.dimension_semantics<parallel>, #tpu.dimension_semantics<parallel>], iteration_bounds = array<i64: 1, 1>, scalar_prefetch = 0 : i64, scratch_operands = 0 : i64, tpu.core_type = #tpu.core_type<tc>, window_params = [{transform_indices = @transform_0, window_bounds = array<i64: 64, 16>}, {transform_indices = @transform_1, window_bounds = array<i64: 16, 512>}, {transform_indices = @transform_2, window_bounds = array<i64: 1, 512>}, {transform_indices = @transform_3, window_bounds = array<i64: 64, 512>}]} {
    %c0 = arith.constant 0 : index
    %c0_0 = arith.constant 0 : index
    %0 = vector.load %arg2[%c0, %c0_0] : memref<64x16xbf16, #tpu.memory_space<vmem>>, vector<64x16xbf16>
    %c0_1 = arith.constant 0 : index
    %c0_2 = arith.constant 0 : index
    %1 = vector.load %arg3[%c0_1, %c0_2] : memref<16x512xbf16, #tpu.memory_space<vmem>>, vector<16x512xbf16>
    %cst = arith.constant dense<0.000000e+00> : vector<64x512xf32>
    %2 = tpu.matmul %0, %1, %cst {dimension_numbers = #tpu.dot_dimension_numbers<[1], [0], [0], [1], [0, 0, 1, 1], [], []>} : vector<64x16xbf16>, vector<16x512xbf16>, vector<64x512xf32> -> vector<64x512xf32>
    %c0_3 = arith.constant 0 : index
    %c0_4 = arith.constant 0 : index
    %3 = vector.load %arg4[%c0_3, %c0_4] : memref<1x512xf32, #tpu.memory_space<vmem>>, vector<1x512xf32>
    %4 = vector.broadcast %3 : vector<1x512xf32> to vector<64x512xf32>
    %5 = arith.addf %2, %4 : vector<64x512xf32>
    %6 = arith.truncf %5 : vector<64x512xf32> to vector<64x512xbf16>
    %c0_5 = arith.constant 0 : index
    %c0_6 = arith.constant 0 : index
    %7 = vector.load %arg5[%c0_5, %c0_6] : memref<64x512xbf16, #tpu.memory_space<vmem>>, vector<64x512xbf16>
    tpu.vector_store %arg5[%c0_5, %c0_6], %6 {strides = array<i32>} : memref<64x512xbf16, #tpu.memory_space<vmem>>, vector<64x512xbf16>,
    return
  }
  func.func @transform_0(%arg0: i32, %arg1: i32) -> (i32, i32) {
    %c0_i32 = arith.constant 0 : i32
    %c0_i32_0 = arith.constant 0 : i32
    return %arg0, %c0_i32 : i32, i32
  }
  func.func @transform_1(%arg0: i32, %arg1: i32) -> (i32, i32) {
    %c0_i32 = arith.constant 0 : i32
    %c0_i32_0 = arith.constant 0 : i32
    return %c0_i32, %arg1 : i32, i32
  }
  func.func @transform_2(%arg0: i32, %arg1: i32) -> (i32, i32) {
    %c0_i32 = arith.constant 0 : i32
    %c0_i32_0 = arith.constant 0 : i32
    return %c0_i32, %arg1 : i32, i32
  }
  func.func @transform_3(%arg0: i32, %arg1: i32) -> (i32, i32) {
    %c0_i32 = arith.constant 0 : i32
    return %arg0, %arg1 : i32, i32
  }
}

</mosaic_0001>

<bundles_post_ra>
// kernel: tpu_custom_call.1
= control target key start
LH: loop header
LB: loop body
LE: loop exit
PB: predicated region body
PF: predicated region fallthrough
CT: control target
= control target key end

     0   :  { %v463_v2 = vmov 0   ;;  %vm90_vm0 = vcmask 130048   ;;  %s574_s0 = inlined_call_operand.vmem [shape: bf16[64,16], index: 0, kind: input, shape index: {}]   ;;  %s575_s1 = inlined_call_operand.vmem [shape: bf16[16,512], index: 1, kind: input, shape index: {}]   ;;  %s576_s2 = inlined_call_operand.vmem [shape: f32[1,512], index: 2, kind: input, shape index: {}]   ;;  %s577_s3 = inlined_call_operand.hbm [shape: bf16[64,512], index: 3, kind: output, shape index: {}]  }
   0x1   :  { %v429_v0 = vld [vmem:[%s575_s1 + $0x4] ss:$16 sps:$4 sm:$0xff]   ;;  %v431_v1 = vld [vmem:[%s575_s1 + $0xc] ss:$16 sps:$4 sm:$0xff]   ;;  %135 = vmatprep.mubr.bf16.mxu0 %v463_v2  ;;  %208 = vmatprep.mubr.bf16.mxu1 %v463_v2  ;;  %v433_v3 = vld [vmem:[%s575_s1] ss:$16 sps:$4 sm:$0xff]  }
   0x2   :  { %103 = vmatprep.subr.bf16.mxu0 %v429_v0  ;;  %v434_v4 = vld [vmem:[%s575_s1 + $0x8] ss:$16 sps:$4 sm:$0xff]   ;;  %176 = vmatprep.subr.bf16.mxu1 %v431_v1  ;;  %v435_v5 = vld [vmem:[%s574_s0] sm:$0xff]  }
   0x3   :  { %104 = vmatpush1.bf16.msra.mxu0 %v433_v3  ;;  %177 = vmatpush1.bf16.msra.mxu1 %v434_v4 }
   0x6   :  { %385 = vmatmul.mubr.msk.bf16.vlgmr.msra.gmra.mrb[0].mxu0 %vm90_vm0, %v435_v5  ;;  %389 = vmatmul.mubr.msk.bf16.vlgmr.msra.gmra.mrb[0].mxu1 %vm90_vm0, %v435_v5 }
   0x7   :  { %8 = vsyncpa [#allocation3], 0  ;;  %145 = vmatprep.mubr.bf16.mxu0 %v463_v2  ;;  %218 = vmatprep.mubr.bf16.mxu1 %v463_v2  ;;  %v436_v6 = vld [vmem:[%s574_s0 + $0x8] sm:$0xff]   ;;  %v437_v7 = vld [vmem:[%s574_s0 + $0x10] sm:$0xff]   ;;  %v30_v9 = vlaneseq }
   0x8   :  { %v438_v8 = vld [vmem:[%s574_s0 + $0x18] sm:$0xff]   ;;  %v28_v13 = vld [vmem:[%s576_s2] sm:$0xf]  ;;  %s464_s0 = smov [#allocation2]  }
   0x9   :  { %v31_v10 = vshrl.u32 %v30_v9, 7  ;;  %s366_s2 = sshll.u32 %s464_s0, 4  ;;  %s367_s2 = int_to_ptr.vmem [resolvable:$true] %s366_s2 }
   0xa   :  { %s439_s29 = scalar_lea.vmem %s367_s2, 2048  ;;  %p444_p1 = scmp.lt.s32.totalorder %s367_s2, %s367_s2 }
   0xb   :  { %v32_v11 = vsub.s32 0, %v31_v10  ;;  %v40_v12 = vsub.s32 2, %v31_v10  ;;  %v36_v14 = vsub.s32 1, %v31_v10  ;;  %v44_v15 = vsub.s32 3, %v31_v10  ;;  %p440_p0 = scmp.ne.s32.totalorder %s367_s2, %s439_s29  ;;  %p445_p2 = scmp.lt.s32.totalorder %s439_s29, %s439_s29 }
   0xd   :  { %v522_v16 = vrot.slane %v28_v13, %v32_v11  ;;  %v524_v17 = vrot.slane %v28_v13, %v40_v12  ;;  %v526_v18 = vrot.slane %v28_v13, %v36_v14  ;;  %v528_v19 = vrot.slane %v28_v13, %v44_v15  ;;  %p446_p3 = por %p445_p2, %p444_p1 }
   0xe   :  { %386 = vmatmul.mubr.msk.bf16.gmra.mrb[4].mxu0 %vm90_vm0, %v436_v6  ;;  %390 = vmatmul.mubr.msk.bf16.gmra.mrb[4].mxu1 %vm90_vm0, %v436_v6 }
   0xf   :  { %155 = vmatprep.mubr.bf16.mxu0 %v463_v2  ;;  %228 = vmatprep.mubr.bf16.mxu1 %v463_v2  ;;  %p447_p4 = pnand %p446_p3, %p440_p0 }
  0x16   :  { %387 = vmatmul.mubr.msk.bf16.gmra.mrb[8].mxu0 %vm90_vm0, %v437_v7  ;;  %391 = vmatmul.mubr.msk.bf16.gmra.mrb[8].mxu1 %vm90_vm0, %v437_v7 }
  0x17   :  { %165 = vmatprep.mubr.bf16.mxu0 %v463_v2  ;;  %238 = vmatprep.mubr.bf16.mxu1 %v463_v2 }
  0x1e   :  { %388 = vmatmul.mubr.msk.bf16.gmra.mrb[12].mxu0 %vm90_vm0, %v438_v8  ;;  %392 = vmatmul.mubr.msk.bf16.gmra.mrb[12].mxu1 %vm90_vm0, %v438_v8 }
  0xd9   :  { %v137_v20 = vpop.f32.mrb[0].mxu0  ;;  %v210_v21 = vpop.f32.mrb[0].mxu1 }
  0xda   :  { %v138_v22 = vadd.f32 %v137_v20, %v522_v16  ;;  %v211_v23 = vadd.f32 %v210_v21, %v524_v17  ;;  %v139_v24 = vpop.f32.mrb[1].mxu0  ;;  %v212_v25 = vpop.f32.mrb[1].mxu1 }
  0xdb   :  { %v140_v26 = vadd.f32 %v139_v24, %v526_v18  ;;  %v213_v27 = vadd.f32 %v212_v25, %v528_v19  ;;  %v141_v28 = vpop.f32.mrb[2].mxu0  ;;  %v214_v29 = vpop.f32.mrb[2].mxu1 }
  0xdc   :  { %v142_v30 = vadd.f32 %v141_v28, %v522_v16  ;;  %v215_v31 = vadd.f32 %v214_v29, %v524_v17  ;;  %v143_v32 = vpop.f32.mrb[3].mxu0  ;;  %v216_v33 = vpop.f32.mrb[3].mxu1 }
  0xdd   :  { %v409_v34 = vpack.c.bf16 %v140_v26, %v138_v22  ;;  %v410_v35 = vpack.c.bf16 %v213_v27, %v211_v23  ;;  %v144_v36 = vadd.f32 %v143_v32, %v526_v18  ;;  %v217_v37 = vadd.f32 %v216_v33, %v528_v19 }
  0xdf   :  { %345 = vst [vmem:[#allocation2] sm:$0xff] %v409_v34  ;;  %346 = vst [vmem:[#allocation2 + $0x8] sm:$0xff] %v410_v35  ;;  %v411_v38 = vpack.c.bf16 %v144_v36, %v142_v30  ;;  %v412_v39 = vpack.c.bf16 %v217_v37, %v215_v31 }
  0xe1   :  { %347 = vst [vmem:[#allocation2 + $0x10] sm:$0xff] %v411_v38  ;;  %348 = vst [vmem:[#allocation2 + $0x18] sm:$0xff] %v412_v39  ;;  %v147_v40 = vpop.f32.mrb[4].mxu0  ;;  %v220_v41 = vpop.f32.mrb[4].mxu1 }
  0xe2   :  { %v148_v42 = vadd.f32 %v147_v40, %v522_v16  ;;  %v221_v43 = vadd.f32 %v220_v41, %v524_v17  ;;  %v149_v44 = vpop.f32.mrb[5].mxu0  ;;  %v222_v45 = vpop.f32.mrb[5].mxu1 }
  0xe3   :  { %v150_v46 = vadd.f32 %v149_v44, %v526_v18  ;;  %v223_v47 = vadd.f32 %v222_v45, %v528_v19  ;;  %v151_v48 = vpop.f32.mrb[6].mxu0  ;;  %v224_v49 = vpop.f32.mrb[6].mxu1 }
  0xe4   :  { %v152_v50 = vadd.f32 %v151_v48, %v522_v16  ;;  %v225_v51 = vadd.f32 %v224_v49, %v524_v17  ;;  %v153_v52 = vpop.f32.mrb[7].mxu0  ;;  %v226_v53 = vpop.f32.mrb[7].mxu1 }
  0xe5   :  { %v413_v54 = vpack.c.bf16 %v150_v46, %v148_v42  ;;  %v414_v55 = vpack.c.bf16 %v223_v47, %v221_v43  ;;  %v154_v56 = vadd.f32 %v153_v52, %v526_v18  ;;  %v227_v57 = vadd.f32 %v226_v53, %v528_v19 }
  0xe7   :  { %349 = vst [vmem:[#allocation2 + $0x20] sm:$0xff] %v413_v54  ;;  %350 = vst [vmem:[#allocation2 + $0x28] sm:$0xff] %v414_v55  ;;  %v415_v58 = vpack.c.bf16 %v154_v56, %v152_v50  ;;  %v416_v59 = vpack.c.bf16 %v227_v57, %v225_v51 }
  0xe9   :  { %351 = vst [vmem:[#allocation2 + $0x30] sm:$0xff] %v415_v58  ;;  %352 = vst [vmem:[#allocation2 + $0x38] sm:$0xff] %v416_v59  ;;  %v157_v60 = vpop.f32.mrb[8].mxu0  ;;  %v230_v61 = vpop.f32.mrb[8].mxu1 }
  0xea   :  { %v158_v62 = vadd.f32 %v157_v60, %v522_v16  ;;  %v231_v63 = vadd.f32 %v230_v61, %v524_v17  ;;  %v159_v0 = vpop.f32.mrb[9].mxu0  ;;  %v232_v1 = vpop.f32.mrb[9].mxu1 }
  0xeb   :  { %v160_v2 = vadd.f32 %v159_v0, %v526_v18  ;;  %v233_v3 = vadd.f32 %v232_v1, %v528_v19  ;;  %v161_v4 = vpop.f32.mrb[10].mxu0  ;;  %v234_v5 = vpop.f32.mrb[10].mxu1 }
  0xec   :  { %v162_v6 = vadd.f32 %v161_v4, %v522_v16  ;;  %v235_v7 = vadd.f32 %v234_v5, %v524_v17  ;;  %v163_v8 = vpop.f32.mrb[11].mxu0  ;;  %v236_v9 = vpop.f32.mrb[11].mxu1 }
  0xed   :  { %v417_v10 = vpack.c.bf16 %v160_v2, %v158_v62  ;;  %v418_v11 = vpack.c.bf16 %v233_v3, %v231_v63  ;;  %v164_v12 = vadd.f32 %v163_v8, %v526_v18  ;;  %v237_v13 = vadd.f32 %v236_v9, %v528_v19 }
  0xef   :  { %353 = vst [vmem:[#allocation2 + $0x40] sm:$0xff] %v417_v10  ;;  %354 = vst [vmem:[#allocation2 + $0x48] sm:$0xff] %v418_v11  ;;  %v419_v14 = vpack.c.bf16 %v164_v12, %v162_v6  ;;  %v420_v15 = vpack.c.bf16 %v237_v13, %v235_v7 }
  0xf1   :  { %355 = vst [vmem:[#allocation2 + $0x50] sm:$0xff] %v419_v14  ;;  %356 = vst [vmem:[#allocation2 + $0x58] sm:$0xff] %v420_v15  ;;  %v167_v20 = vpop.f32.mrb[12].mxu0  ;;  %v240_v21 = vpop.f32.mrb[12].mxu1 }
  0xf2   :  { %v168_v22 = vadd.f32 %v167_v20, %v522_v16  ;;  %v241_v23 = vadd.f32 %v240_v21, %v524_v17  ;;  %v169_v24 = vpop.f32.mrb[13].mxu0  ;;  %v242_v25 = vpop.f32.mrb[13].mxu1 }
  0xf3   :  { %v170_v26 = vadd.f32 %v169_v24, %v526_v18  ;;  %v243_v27 = vadd.f32 %v242_v25, %v528_v19  ;;  %v171_v28 = vpop.f32.mrb[14].mxu0  ;;  %v244_v29 = vpop.f32.mrb[14].mxu1 }
  0xf4   :  { %v172_v30 = vadd.f32 %v171_v28, %v522_v16  ;;  %v245_v31 = vadd.f32 %v244_v29, %v524_v17  ;;  %v173_v32 = vpop.f32.mrb[15].mxu0  ;;  %v246_v33 = vpop.f32.mrb[15].mxu1 }
  0xf5   :  { %v421_v34 = vpack.c.bf16 %v170_v26, %v168_v22  ;;  %v422_v35 = vpack.c.bf16 %v243_v27, %v241_v23  ;;  %v174_v36 = vadd.f32 %v173_v32, %v526_v18  ;;  %v247_v37 = vadd.f32 %v246_v33, %v528_v19 }
  0xf7   :  { %357 = vst [vmem:[#allocation2 + $0x60] sm:$0xff] %v421_v34  ;;  %358 = vst [vmem:[#allocation2 + $0x68] sm:$0xff] %v422_v35  ;;  %v423_v38 = vpack.c.bf16 %v174_v36, %v172_v30  ;;  %v424_v39 = vpack.c.bf16 %v247_v37, %v245_v31 }
  0xf9   :  { %359 = vst [vmem:[#allocation2 + $0x70] sm:$0xff] %v423_v38  ;;  %360 = vst [vmem:[#allocation2 + $0x78] sm:$0xff] %v424_v39 }
  0xfa   :  { %450 = shalt.err (!%p447_p4)
}
  0xfb   :  { %s451_s5 = scalar_lea.hbm %s577_s3, 2048 }
  0xfc   :  { %p452_p5 = scmp.ne.s32.totalorder %s577_s3, %s451_s5  ;;  %p455_p6 = scmp.lt.u32.totalorder %s451_s5, %s577_s3 }
  0xfe   :  { %p457_p7 = pnand %p455_p6, %p452_p5 }
 0x100   :  { %460 = shalt.err (!%p457_p7)
}
 0x101   :  { %s465_s10 = smov 256   ;;  %s466_s11 = smov 16  }
 0x102   :  { %372 = dma.vmem_to_hbm [thread:$0]  %s367_s2, 2048, %s577_s3, [#allocation3], %s465_s10, %s465_s10, %s466_s11  }
 0x103   :  { %461 = dma.done.wait [#allocation3], 2048  }
 0x104   :  { %462 = vsyncadd [#allocation3], 4294965248 }
 0x105   :  { %376 = vsyncpa [#allocation3], 1 }

</bundles_post_ra>
